<compile_context>
chip_gen: v7x
topology: tpu7x:2x2x1
jax: 0.10.0
libtpu: 0.0.40
codegen_flags: <defaults>
</compile_context>

<pallas_src>
import functools

import jax
import jax.numpy as jnp
from jax.experimental import pallas as pl
from jax.experimental.pallas import tpu as pltpu

# ---- module constants (from PromptLearner.__init__ / clip.tokenize) ----
N_CTX = 4                                      # "X X X X" context tokens
N_CLS_CTX = 4                                  # learnable per-class context tokens
CTX_DIM = 512                                  # CLIP text embedding dim
SEQ_LEN = 77                                   # CLIP tokenizer context length
PREFIX_LEN = N_CTX + 1                         # 5
SUFFIX_LEN = SEQ_LEN - PREFIX_LEN - N_CLS_CTX  # 68


def _prompt_kernel_resident(blk_b, label_ref, template_ref, cls_ref, out_ref,
                            *maybe_acc):
    """Default path: cls table resident in VMEM, gathered with dynamic reads.

    label_ref:    SMEM (B_padded,) int32      — scalar-prefetched class ids.
    template_ref: VMEM (1, 77, 512)           — fused prefix|hole|suffix.
    cls_ref:      VMEM (num_class, 4, 512)    — resident class-context table.
    out_ref:      VMEM (blk_b, 77, 512)       — output tile.
    maybe_acc:    optional f32 scratch tile (used for sub-32-bit outputs).
    """
    acc = maybe_acc[0] if maybe_acc else out_ref
    base = pl.program_id(0) * blk_b

    # Bulk, vreg-aligned store of the template into every batch row.
    acc[...] = jnp.broadcast_to(template_ref[...], acc.shape).astype(acc.dtype)

    # Patch the 4 class-context rows (rows 5..8) per batch element.
    for j in range(blk_b):
        acc[j, pl.ds(PREFIX_LEN, N_CLS_CTX), :] = (
            cls_ref[label_ref[base + j]].astype(acc.dtype))

    if maybe_acc:
        # Single aligned full-tile cast+store (e.g. f32 scratch -> bf16 out).
        out_ref[...] = acc[...].astype(out_ref.dtype)


def _prompt_kernel_gather(blk_b, label_ref, template_ref, cls_hbm, out_ref,
                          cls_buf, sem, *maybe_acc):
    """Fallback path for very large class tables: manual HBM gather DMAs
    (issued up front, overlapped with the bulk template store)."""
    acc = maybe_acc[0] if maybe_acc else out_ref
    base = pl.program_id(0) * blk_b

    # 1) Issue all gather DMAs (cls_ctx[label[base+j]] -> staging) up front.
    copies = []
    for j in range(blk_b):
        cp = pltpu.make_async_copy(
            cls_hbm.at[label_ref[base + j]], cls_buf.at[j], sem.at[j])
        cp.start()
        copies.append(cp)

    # 2) Bulk aligned template store while the gather DMAs are in flight.
    acc[...] = jnp.broadcast_to(template_ref[...], acc.shape).astype(acc.dtype)

    # 3) Patch the class-context window per element as its DMA completes.
    for j in range(blk_b):
        copies[j].wait()
        acc[j, pl.ds(PREFIX_LEN, N_CLS_CTX), :] = cls_buf[j].astype(acc.dtype)

    if maybe_acc:
        out_ref[...] = acc[...].astype(out_ref.dtype)


def prompt_learner_forward(label, cls_ctx, token_prefix, token_suffix, *,
                           blk_b=32, out_dtype=None,
                           max_resident_cls_bytes=8 << 20):
    """Pallas equivalent of PromptLearner.forward.

    Args:
      label:        (B,) int class ids.
      cls_ctx:      (num_class, N_CLS_CTX, CTX_DIM) learnable class contexts.
      token_prefix: (1, PREFIX_LEN, CTX_DIM) frozen prefix embedding.
      token_suffix: (1, SUFFIX_LEN, CTX_DIM) frozen suffix embedding.
      blk_b:        batch elements per grid step.  Tuning: v7x/v6e ~48-64,
                    v5e 16-32 (vmem_limit_bytes is derived automatically).
      out_dtype:    output dtype; pass jnp.bfloat16/float16 if the downstream
                    CLIP text encoder runs in half precision (halves HBM
                    writeback bytes).  Defaults to cls_ctx.dtype.
      max_resident_cls_bytes: class-table size below which the table is kept
                    resident in VMEM (no manual gather DMAs).

    Returns:
      prompts: (B, SEQ_LEN, CTX_DIM) in out_dtype.
    """
    b = label.shape[0]
    num_class = cls_ctx.shape[0]
    param_dtype = cls_ctx.dtype
    out_dtype = param_dtype if out_dtype is None else jnp.dtype(out_dtype)
    param_itemsize = jnp.dtype(param_dtype).itemsize
    out_itemsize = jnp.dtype(out_dtype).itemsize
    # Sub-32-bit outputs: patch a f32 scratch tile, cast once on the final
    # aligned store (avoids packed-dtype sub-tile stores at sublane offset 5).
    needs_acc = out_itemsize < 4

    blk_b = max(1, min(blk_b, b))
    grid = pl.cdiv(b, blk_b)
    b_padded = grid * blk_b

    # Untrusted labels: clamp so gather indices/addresses stay in range.
    label = jnp.clip(label.astype(jnp.int32), 0, num_class - 1)
    if b_padded != b:
        # Only the tiny label vector is padded; the output keeps shape
        # (b, 77, 512) and Pallas masks the ragged last leading-dim block.
        label = jnp.pad(label, (0, b_padded - b))

    # Fused, sublane-aligned template: prefix rows [0:5], hole rows [5:9]
    # (overwritten in-kernel), suffix rows [9:77].
    template = jnp.concatenate(
        [token_prefix.astype(param_dtype),
         jnp.zeros((1, N_CLS_CTX, CTX_DIM), param_dtype),
         token_suffix.astype(param_dtype)],
        axis=1)  # (1, 77, 512)

    cls_bytes = num_class * N_CLS_CTX * CTX_DIM * param_itemsize
    resident = cls_bytes <= max_resident_cls_bytes

    template_spec = pl.BlockSpec((1, SEQ_LEN, CTX_DIM), lambda i, lab: (0, 0, 0))
    out_spec = pl.BlockSpec((blk_b, SEQ_LEN, CTX_DIM), lambda i, lab: (i, 0, 0))

    scratch = []
    if resident:
        kernel = functools.partial(_prompt_kernel_resident, blk_b)
        # Whole class table resident in VMEM (constant block index).
        cls_spec = pl.BlockSpec((num_class, N_CLS_CTX, CTX_DIM),
                                lambda i, lab: (0, 0, 0))
        cls_vmem_bytes = 2 * cls_bytes
    else:
        kernel = functools.partial(_prompt_kernel_gather, blk_b)
        # Raw HBM ref; gathered manually per element.
        cls_spec = pl.BlockSpec(memory_space=pl.ANY)
        scratch += [pltpu.VMEM((blk_b, N_CLS_CTX, CTX_DIM), param_dtype),
                    pltpu.SemaphoreType.DMA((blk_b,))]
        cls_vmem_bytes = blk_b * N_CLS_CTX * CTX_DIM * param_itemsize
    if needs_acc:
        scratch += [pltpu.VMEM((blk_b, SEQ_LEN, CTX_DIM), jnp.float32)]

    # VMEM budget: double-buffered output tile + resident template + class
    # table/staging + optional f32 accumulator tile, plus headroom.
    vmem_need = (2 * blk_b * SEQ_LEN * CTX_DIM * out_itemsize
                 + 2 * SEQ_LEN * CTX_DIM * param_itemsize
                 + cls_vmem_bytes)
    if needs_acc:
        vmem_need += blk_b * SEQ_LEN * CTX_DIM * 4
    vmem_limit = int(max(vmem_need + (4 << 20), 16 << 20))

    grid_spec = pltpu.PrefetchScalarGridSpec(
        num_scalar_prefetch=1,
        grid=(grid,),
        in_specs=[template_spec, cls_spec],
        out_specs=out_spec,
        scratch_shapes=scratch,
    )

    return pl.pallas_call(
        kernel,
        out_shape=jax.ShapeDtypeStruct((b, SEQ_LEN, CTX_DIM), out_dtype),
        grid_spec=grid_spec,
        compiler_params=pltpu.CompilerParams(
            dimension_semantics=("parallel",),
            vmem_limit_bytes=vmem_limit),
    )(label, template, cls_ctx)


def make_params(num_class, key, dtype=jnp.float32):
    """Deterministic synthetic parameters matching __init__ shapes."""
    # TODO(synk): clip.tokenize + token_embedding are host-side __init__ work;
    # synthesized here as deterministic random buffers of the same shapes.
    k_cls, k_emb = jax.random.split(key)
    # nn.init.normal_(cls_vectors, std=0.02)
    cls_ctx = (0.02 * jax.random.normal(
        k_cls, (num_class, N_CLS_CTX, CTX_DIM))).astype(dtype)
    # synthetic token_embedding(tokenized_prompts): (1, 77, 512)
    embedding = jax.random.normal(k_emb, (1, SEQ_LEN, CTX_DIM)).astype(dtype)
    token_prefix = embedding[:, :PREFIX_LEN, :]              # (1, 5, 512)
    token_suffix = embedding[:, PREFIX_LEN + N_CLS_CTX:, :]  # (1, 68, 512)
    return cls_ctx, token_prefix, token_suffix


def _reference(label, cls_ctx, token_prefix, token_suffix):
    b = label.shape[0]
    return jnp.concatenate(
        [jnp.broadcast_to(token_prefix, (b, PREFIX_LEN, CTX_DIM)),
         cls_ctx[label],
         jnp.broadcast_to(token_suffix, (b, SUFFIX_LEN, CTX_DIM))],
        axis=1)


if __name__ == "__main__":
    num_class = 8

    key = jax.random.PRNGKey(0)
    k_params, k_lab1, k_lab2 = jax.random.split(key, 3)
    cls_ctx, token_prefix, token_suffix = make_params(num_class, k_params)

    def ref(label):
        return _reference(label, cls_ctx, token_prefix, token_suffix)

    # Case 1: batch divides the block exactly (resident VMEM class table).
    label1 = jax.random.randint(k_lab1, (2,), 0, num_class, dtype=jnp.int32)
    out1 = jax.block_until_ready(prompt_learner_forward(
        label1, cls_ctx, token_prefix, token_suffix))
    assert out1.shape == (2, SEQ_LEN, CTX_DIM), out1.shape
    assert jnp.array_equal(out1, ref(label1)), "mismatch (case 1)"

    # Case 2: ragged last block (B=6, blk_b=4 -> grid=(2,)), no post-slice.
    label2 = jax.random.randint(k_lab2, (6,), 0, num_class, dtype=jnp.int32)
    out2 = jax.block_until_ready(prompt_learner_forward(
        label2, cls_ctx, token_prefix, token_suffix, blk_b=4))
    assert out2.shape == (6, SEQ_LEN, CTX_DIM), out2.shape
    assert jnp.array_equal(out2, ref(label2)), "mismatch (case 2)"

    # Case 3: bf16 output (halved HBM writeback; f32 scratch + single cast).
    out3 = jax.block_until_ready(prompt_learner_forward(
        label2, cls_ctx, token_prefix, token_suffix, blk_b=4,
        out_dtype=jnp.bfloat16))
    assert out3.shape == (6, SEQ_LEN, CTX_DIM) and out3.dtype == jnp.bfloat16
    assert jnp.allclose(out3.astype(jnp.float32), ref(label2),
                        atol=5e-2, rtol=0), "mismatch (case 3)"

    # Case 4: forced HBM-gather fallback path (as used for huge num_class).
    out4 = jax.block_until_ready(prompt_learner_forward(
        label2, cls_ctx, token_prefix, token_suffix, blk_b=4,
        max_resident_cls_bytes=0))
    assert out4.shape == (6, SEQ_LEN, CTX_DIM), out4.shape
    assert jnp.array_equal(out4, ref(label2)), "mismatch (case 4)"

    print("KERNEL_OK")
</pallas_src>

<mosaic_0001>
module attributes {stable_mosaic.version = 11 : i64} {
  func.func @_prompt_kernel_resident(%arg0: i32, %arg1: memref<2xi32, #tpu.memory_space<smem>>, %arg2: memref<1x77x512xf32, #tpu.memory_space<vmem>>, %arg3: memref<8x4x512xf32, #tpu.memory_space<vmem>>, %arg4: memref<2x77x512xf32, #tpu.memory_space<vmem>>) attributes {dimension_semantics = [#tpu.dimension_semantics<parallel>], iteration_bounds = array<i64: 1>, scalar_prefetch = 1 : i64, scratch_operands = 0 : i64, tpu.core_type = #tpu.core_type<tc>, window_params = [{pipeline_mode = #tpu.pipeline_mode<synchronous>, transform_indices = @transform_0, window_bounds = array<i64: 1, 77, 512>}, {pipeline_mode = #tpu.pipeline_mode<synchronous>, transform_indices = @transform_1, window_bounds = array<i64: 8, 4, 512>}, {transform_indices = @transform_2, window_bounds = array<i64: 2, 77, 512>}]} {
    %c2_i32 = arith.constant 2 : i32
    %0 = arith.muli %arg0, %c2_i32 : i32
    %c0 = arith.constant 0 : index
    %c0_0 = arith.constant 0 : index
    %c0_1 = arith.constant 0 : index
    %1 = vector.load %arg2[%c0, %c0_0, %c0_1] : memref<1x77x512xf32, #tpu.memory_space<vmem>>, vector<1x77x512xf32>
    %2 = vector.shape_cast %1 : vector<1x77x512xf32> to vector<1x77x512xf32>
    %3 = vector.broadcast %2 : vector<1x77x512xf32> to vector<2x77x512xf32>
    %c0_2 = arith.constant 0 : index
    %c0_3 = arith.constant 0 : index
    %c0_4 = arith.constant 0 : index
    %4 = vector.load %arg4[%c0_2, %c0_3, %c0_4] : memref<2x77x512xf32, #tpu.memory_space<vmem>>, vector<2x77x512xf32>
    tpu.vector_store %arg4[%c0_2, %c0_3, %c0_4], %3 {strides = array<i32>} : memref<2x77x512xf32, #tpu.memory_space<vmem>>, vector<2x77x512xf32>,
    %c0_i32 = arith.constant 0 : i32
    %5 = arith.addi %0, %c0_i32 : i32
    %6 = arith.index_cast %5 : i32 to index
    %7 = memref.load %arg1[%6] : memref<2xi32, #tpu.memory_space<smem>>
    %8 = arith.index_cast %7 : i32 to index
    %c0_5 = arith.constant 0 : index
    %c0_6 = arith.constant 0 : index
    %9 = vector.load %arg3[%8, %c0_5, %c0_6] : memref<8x4x512xf32, #tpu.memory_space<vmem>>, vector<1x4x512xf32>
    %10 = vector.shape_cast %9 : vector<1x4x512xf32> to vector<4x512xf32>
    %c0_7 = arith.constant 0 : index
    %c5 = arith.constant 5 : index
    %c0_8 = arith.constant 0 : index
    %11 = vector.load %arg4[%c0_7, %c5, %c0_8] : memref<2x77x512xf32, #tpu.memory_space<vmem>>, vector<1x4x512xf32>
    %12 = vector.shape_cast %11 : vector<1x4x512xf32> to vector<4x512xf32>
    %13 = vector.shape_cast %10 : vector<4x512xf32> to vector<1x4x512xf32>
    tpu.vector_store %arg4[%c0_7, %c5, %c0_8], %13 {strides = array<i32>} : memref<2x77x512xf32, #tpu.memory_space<vmem>>, vector<1x4x512xf32>,
    %c1_i32 = arith.constant 1 : i32
    %14 = arith.addi %0, %c1_i32 : i32
    %15 = arith.index_cast %14 : i32 to index
    %16 = memref.load %arg1[%15] : memref<2xi32, #tpu.memory_space<smem>>
    %17 = arith.index_cast %16 : i32 to index
    %c0_9 = arith.constant 0 : index
    %c0_10 = arith.constant 0 : index
    %18 = vector.load %arg3[%17, %c0_9, %c0_10] : memref<8x4x512xf32, #tpu.memory_space<vmem>>, vector<1x4x512xf32>
    %19 = vector.shape_cast %18 : vector<1x4x512xf32> to vector<4x512xf32>
    %c1 = arith.constant 1 : index
    %c5_11 = arith.constant 5 : index
    %c0_12 = arith.constant 0 : index
    %20 = vector.load %arg4[%c1, %c5_11, %c0_12] : memref<2x77x512xf32, #tpu.memory_space<vmem>>, vector<1x4x512xf32>
    %21 = vector.shape_cast %20 : vector<1x4x512xf32> to vector<4x512xf32>
    %22 = vector.shape_cast %19 : vector<4x512xf32> to vector<1x4x512xf32>
    tpu.vector_store %arg4[%c1, %c5_11, %c0_12], %22 {strides = array<i32>} : memref<2x77x512xf32, #tpu.memory_space<vmem>>, vector<1x4x512xf32>,
    return
  }
  func.func @transform_0(%arg0: i32, %arg1: memref<2xi32, #tpu.memory_space<smem>>) -> (i32, i32, i32) {
    %c0_i32 = arith.constant 0 : i32
    %c0_i32_0 = arith.constant 0 : i32
    %c0_i32_1 = arith.constant 0 : i32
    %c0_i32_2 = arith.constant 0 : i32
    return %c0_i32, %c0_i32_0, %c0_i32_1 : i32, i32, i32
  }
  func.func @transform_1(%arg0: i32, %arg1: memref<2xi32, #tpu.memory_space<smem>>) -> (i32, i32, i32) {
    %c0_i32 = arith.constant 0 : i32
    %c0_i32_0 = arith.constant 0 : i32
    %c0_i32_1 = arith.constant 0 : i32
    %c0_i32_2 = arith.constant 0 : i32
    return %c0_i32, %c0_i32_0, %c0_i32_1 : i32, i32, i32
  }
  func.func @transform_2(%arg0: i32, %arg1: memref<2xi32, #tpu.memory_space<smem>>) -> (i32, i32, i32) {
    %c0_i32 = arith.constant 0 : i32
    %c0_i32_0 = arith.constant 0 : i32
    %c0_i32_1 = arith.constant 0 : i32
    return %arg0, %c0_i32, %c0_i32_0 : i32, i32, i32
  }
}

</mosaic_0001>

<bundles_post_ra>
// kernel: tpu_custom_call.1
= control target key start
LH: loop header
LB: loop body
LE: loop exit
PB: predicated region body
PF: predicated region fallthrough
CT: control target
= control target key end

     0   :  { %s659_s0 = inlined_call_operand.vmem [shape: s32[2], index: 0, kind: input, shape index: {}]   ;;  %s660_s1 = inlined_call_operand.vmem [shape: f32[1,77,512], index: 1, kind: input, shape index: {}]   ;;  %s661_s2 = inlined_call_operand.vmem [shape: f32[8,4,512], index: 2, kind: input, shape index: {}]   ;;  %s662_s3 = inlined_call_operand.vmem [shape: f32[2,77,512], index: 3, kind: output, shape index: {}]  }
   0x1   :  { %s8_s14 = sshll.u32 %s659_s0, 4  ;;  %s9_s14 = int_to_ptr.vmem [resolvable:$true] %s8_s14 }
   0x2   :  { %s221_s15 = scalar_lea.vmem %s9_s14, 16  ;;  %p226_p1 = scmp.lt.s32.totalorder %s9_s14, %s9_s14 }
   0x3   :  { %p222_p0 = scmp.ne.s32.totalorder %s9_s14, %s221_s15  ;;  %p227_p2 = scmp.lt.s32.totalorder %s221_s15, %s221_s15 }
   0x5   :  { %p228_p3 = por %p227_p2, %p226_p1 }
   0x7   :  { %p229_p4 = pnand %p228_p3, %p222_p0 }
   0x9   :  { %232 = shalt.err (!%p229_p4)  }
   0xa   :  { %s235_s16 = smov [#allocation3]  }
   0xb   :  { %11 = dma.vmem_to_smem %s9_s14, 16, %s235_s16, [#allocation2] }
   0xc   :  { %233 = dma.done.wait [#allocation2], 16 }
   0xd   :  { %234 = vsyncadd [#allocation2], 4294967280 }
   0xe   :  { %13 = sfence }
   0xf   :  { %v19_v0 = vld [vmem:[%s660_s1] sm:$0xff]  ;;  %v20_v1 = vld [vmem:[%s660_s1 + $0x8] sm:$0xff]  ;;  %v21_v2 = vld [vmem:[%s660_s1 + $0x10] sm:$0xff]  ;;  %s268_s22 = sld [smem:[#allocation3]]  ;;  %s297_s14 = sld [smem:[#allocation3 + $0x1]] }
  0x10   :  { %59 = vst [vmem:[%s662_s3] sm:$0xff] %v19_v0  ;;  %99 = vst [vmem:[%s662_s3 + $0x140] sm:$0xff] %v19_v0  ;;  %v22_v3 = vld [vmem:[%s660_s1 + $0x18] sm:$0xff]  ;;  %v23_v4 = vld [vmem:[%s660_s1 + $0x20] sm:$0xff] }
  0x11   :  { %60 = vst [vmem:[%s662_s3 + $0x8] sm:$0xff] %v20_v1  ;;  %100 = vst [vmem:[%s662_s3 + $0x148] sm:$0xff] %v20_v1  ;;  %v24_v5 = vld [vmem:[%s660_s1 + $0x28] sm:$0xff]  ;;  %v25_v6 = vld [vmem:[%s660_s1 + $0x30] sm:$0xff] }
  0x12   :  { %61 = vst [vmem:[%s662_s3 + $0x10] sm:$0xff] %v21_v2  ;;  %101 = vst [vmem:[%s662_s3 + $0x150] sm:$0xff] %v21_v2  ;;  %v26_v7 = vld [vmem:[%s660_s1 + $0x38] sm:$0xff]  ;;  %v27_v8 = vld [vmem:[%s660_s1 + $0x40] sm:$0xff] }
  0x13   :  { %62 = vst [vmem:[%s662_s3 + $0x18] sm:$0xff] %v22_v3  ;;  %102 = vst [vmem:[%s662_s3 + $0x158] sm:$0xff] %v22_v3  ;;  %v28_v9 = vld [vmem:[%s660_s1 + $0x48] sm:$0xff]  ;;  %v29_v10 = vld [vmem:[%s660_s1 + $0x50] sm:$0xff] }
  0x14   :  { %63 = vst [vmem:[%s662_s3 + $0x20] sm:$0xff] %v23_v4  ;;  %103 = vst [vmem:[%s662_s3 + $0x160] sm:$0xff] %v23_v4  ;;  %v30_v11 = vld [vmem:[%s660_s1 + $0x58] sm:$0xff]  ;;  %v31_v12 = vld [vmem:[%s660_s1 + $0x60] sm:$0xff] }
  0x15   :  { %64 = vst [vmem:[%s662_s3 + $0x28] sm:$0xff] %v24_v5  ;;  %104 = vst [vmem:[%s662_s3 + $0x168] sm:$0xff] %v24_v5  ;;  %v32_v13 = vld [vmem:[%s660_s1 + $0x68] sm:$0xff]  ;;  %v33_v14 = vld [vmem:[%s660_s1 + $0x70] sm:$0xff]  ;;  %s214_s19 = sshll.u32 %s268_s22, 4  ;;  %s215_s11 = sshll.u32 %s297_s14, 4 }
  0x16   :  { %65 = vst [vmem:[%s662_s3 + $0x30] sm:$0xff] %v25_v6  ;;  %105 = vst [vmem:[%s662_s3 + $0x170] sm:$0xff] %v25_v6  ;;  %v34_v15 = vld [vmem:[%s660_s1 + $0x78] sm:$0xff]  ;;  %v35_v16 = vld [vmem:[%s660_s1 + $0x80] sm:$0xff]  ;;  %s142_s28 = scalar_lea.vmem %s661_s2, %s214_s19  ;;  %s169_s23 = scalar_lea.vmem %s661_s2, %s215_s11 }
  0x17   :  { %66 = vst [vmem:[%s662_s3 + $0x38] sm:$0xff] %v26_v7  ;;  %106 = vst [vmem:[%s662_s3 + $0x178] sm:$0xff] %v26_v7  ;;  %v36_v17 = vld [vmem:[%s660_s1 + $0x88] sm:$0xff]  ;;  %v37_v18 = vld [vmem:[%s660_s1 + $0x90] sm:$0xff] }
  0x18   :  { %67 = vst [vmem:[%s662_s3 + $0x40] sm:$0xff] %v27_v8  ;;  %107 = vst [vmem:[%s662_s3 + $0x180] sm:$0xff] %v27_v8  ;;  %v38_v19 = vld [vmem:[%s660_s1 + $0x98] sm:$0xff]  ;;  %v39_v20 = vld [vmem:[%s660_s1 + $0xa0] sm:$0xff] }
  0x19   :  { %68 = vst [vmem:[%s662_s3 + $0x48] sm:$0xff] %v28_v9  ;;  %108 = vst [vmem:[%s662_s3 + $0x188] sm:$0xff] %v28_v9  ;;  %v40_v21 = vld [vmem:[%s660_s1 + $0xa8] sm:$0xff]  ;;  %v41_v22 = vld [vmem:[%s660_s1 + $0xb0] sm:$0xff] }
  0x1a   :  { %69 = vst [vmem:[%s662_s3 + $0x50] sm:$0xff] %v29_v10  ;;  %109 = vst [vmem:[%s662_s3 + $0x190] sm:$0xff] %v29_v10  ;;  %v42_v23 = vld [vmem:[%s660_s1 + $0xb8] sm:$0xff]  ;;  %v43_v24 = vld [vmem:[%s660_s1 + $0xc0] sm:$0xff] }
  0x1b   :  { %70 = vst [vmem:[%s662_s3 + $0x58] sm:$0xff] %v30_v11  ;;  %110 = vst [vmem:[%s662_s3 + $0x198] sm:$0xff] %v30_v11  ;;  %v44_v25 = vld [vmem:[%s660_s1 + $0xc8] sm:$0xff]  ;;  %v45_v26 = vld [vmem:[%s660_s1 + $0xd0] sm:$0xff] }
  0x1c   :  { %71 = vst [vmem:[%s662_s3 + $0x60] sm:$0xff] %v31_v12  ;;  %111 = vst [vmem:[%s662_s3 + $0x1a0] sm:$0xff] %v31_v12  ;;  %v46_v27 = vld [vmem:[%s660_s1 + $0xd8] sm:$0xff]  ;;  %v47_v28 = vld [vmem:[%s660_s1 + $0xe0] sm:$0xff] }
  0x1d   :  { %72 = vst [vmem:[%s662_s3 + $0x68] sm:$0xff] %v32_v13  ;;  %112 = vst [vmem:[%s662_s3 + $0x1a8] sm:$0xff] %v32_v13  ;;  %v48_v29 = vld [vmem:[%s660_s1 + $0xe8] sm:$0xff]  ;;  %v49_v30 = vld [vmem:[%s660_s1 + $0xf0] sm:$0xff] }
  0x1e   :  { %73 = vst [vmem:[%s662_s3 + $0x70] sm:$0xff] %v33_v14  ;;  %113 = vst [vmem:[%s662_s3 + $0x1b0] sm:$0xff] %v33_v14  ;;  %v50_v31 = vld [vmem:[%s660_s1 + $0xf8] sm:$0xff]  ;;  %v51_v32 = vld [vmem:[%s660_s1 + $0x100] sm:$0xff] }
  0x1f   :  { %74 = vst [vmem:[%s662_s3 + $0x78] sm:$0xff] %v34_v15  ;;  %114 = vst [vmem:[%s662_s3 + $0x1b8] sm:$0xff] %v34_v15  ;;  %v52_v33 = vld [vmem:[%s660_s1 + $0x108] sm:$0xff]  ;;  %v53_v34 = vld [vmem:[%s660_s1 + $0x110] sm:$0xff] }
  0x20   :  { %75 = vst [vmem:[%s662_s3 + $0x80] sm:$0xff] %v35_v16  ;;  %115 = vst [vmem:[%s662_s3 + $0x1c0] sm:$0xff] %v35_v16  ;;  %v54_v35 = vld [vmem:[%s660_s1 + $0x118] sm:$0xff]  ;;  %v55_v36 = vld [vmem:[%s660_s1 + $0x120] sm:$0x1f] }
  0x21   :  { %76 = vst [vmem:[%s662_s3 + $0x88] sm:$0xff] %v36_v17  ;;  %116 = vst [vmem:[%s662_s3 + $0x1c8] sm:$0xff] %v36_v17  ;;  %v56_v37 = vld [vmem:[%s660_s1 + $0x128] sm:$0x1f]  ;;  %v57_v38 = vld [vmem:[%s660_s1 + $0x130] sm:$0x1f] }
  0x22   :  { %77 = vst [vmem:[%s662_s3 + $0x90] sm:$0xff] %v37_v18  ;;  %117 = vst [vmem:[%s662_s3 + $0x1d0] sm:$0xff] %v37_v18  ;;  %v58_v39 = vld [vmem:[%s660_s1 + $0x138] sm:$0x1f]  ;;  %v143_v40 = vld [vmem:[%s142_s28] sm:$0xff] }
  0x23   :  { %78 = vst [vmem:[%s662_s3 + $0x98] sm:$0xff] %v38_v19  ;;  %118 = vst [vmem:[%s662_s3 + $0x1d8] sm:$0xff] %v38_v19  ;;  %v144_v41 = vld [vmem:[%s142_s28 + $0x8] sm:$0xff]  ;;  %v149_v42 = vrot.slane %v143_v40, 3  ;;  %v147_v43 = vcombine.high %v143_v40, %v143_v40  ;;  %v170_v46 = vld [vmem:[%s169_s23] sm:$0xff] }
  0x24   :  { %79 = vst [vmem:[%s662_s3 + $0xa0] sm:$0xff] %v39_v20  ;;  %119 = vst [vmem:[%s662_s3 + $0x1e0] sm:$0xff] %v39_v20  ;;  %v151_v44 = vrot.slane %v144_v41, 3  ;;  %v148_v45 = vcombine.high %v144_v41, %v144_v41  ;;  %v171_v47 = vld [vmem:[%s169_s23 + $0x8] sm:$0xff]  ;;  %v176_v48 = vrot.slane %v170_v46, 3  ;;  %v174_v49 = vcombine.high %v170_v46, %v170_v46 }
  0x25   :  { %80 = vst [vmem:[%s662_s3 + $0xa8] sm:$0xff] %v40_v21  ;;  %120 = vst [vmem:[%s662_s3 + $0x1e8] sm:$0xff] %v40_v21  ;;  %v178_v50 = vrot.slane %v171_v47, 3  ;;  %v175_v51 = vcombine.high %v171_v47, %v171_v47  ;;  %v150_v52 = vrot.slane %v147_v43, 3 }
  0x26   :  { %81 = vst [vmem:[%s662_s3 + $0xb0] sm:$0xff] %v41_v22  ;;  %121 = vst [vmem:[%s662_s3 + $0x1f0] sm:$0xff] %v41_v22  ;;  %v152_v53 = vrot.slane %v148_v45, 3  ;;  %v177_v54 = vrot.slane %v174_v49, 3 }
  0x27   :  { %82 = vst [vmem:[%s662_s3 + $0xb8] sm:$0xff] %v42_v23  ;;  %122 = vst [vmem:[%s662_s3 + $0x1f8] sm:$0xff] %v42_v23  ;;  %v179_v55 = vrot.slane %v175_v51, 3 }
  0x28   :  { %83 = vst [vmem:[%s662_s3 + $0xc0] sm:$0xff] %v43_v24  ;;  %123 = vst [vmem:[%s662_s3 + $0x200] sm:$0xff] %v43_v24 }
  0x29   :  { %84 = vst [vmem:[%s662_s3 + $0xc8] sm:$0xff] %v44_v25  ;;  %124 = vst [vmem:[%s662_s3 + $0x208] sm:$0xff] %v44_v25 }
  0x2a   :  { %85 = vst [vmem:[%s662_s3 + $0xd0] sm:$0xff] %v45_v26  ;;  %125 = vst [vmem:[%s662_s3 + $0x210] sm:$0xff] %v45_v26 }
  0x2b   :  { %86 = vst [vmem:[%s662_s3 + $0xd8] sm:$0xff] %v46_v27  ;;  %126 = vst [vmem:[%s662_s3 + $0x218] sm:$0xff] %v46_v27 }
  0x2c   :  { %87 = vst [vmem:[%s662_s3 + $0xe0] sm:$0xff] %v47_v28  ;;  %127 = vst [vmem:[%s662_s3 + $0x220] sm:$0xff] %v47_v28 }
  0x2d   :  { %88 = vst [vmem:[%s662_s3 + $0xe8] sm:$0xff] %v48_v29  ;;  %128 = vst [vmem:[%s662_s3 + $0x228] sm:$0xff] %v48_v29 }
  0x2e   :  { %89 = vst [vmem:[%s662_s3 + $0xf0] sm:$0xff] %v49_v30  ;;  %129 = vst [vmem:[%s662_s3 + $0x230] sm:$0xff] %v49_v30 }
  0x2f   :  { %90 = vst [vmem:[%s662_s3 + $0xf8] sm:$0xff] %v50_v31  ;;  %130 = vst [vmem:[%s662_s3 + $0x238] sm:$0xff] %v50_v31 }
  0x30   :  { %91 = vst [vmem:[%s662_s3 + $0x100] sm:$0xff] %v51_v32  ;;  %131 = vst [vmem:[%s662_s3 + $0x240] sm:$0xff] %v51_v32 }
  0x31   :  { %92 = vst [vmem:[%s662_s3 + $0x108] sm:$0xff] %v52_v33  ;;  %132 = vst [vmem:[%s662_s3 + $0x248] sm:$0xff] %v52_v33 }
  0x32   :  { %93 = vst [vmem:[%s662_s3 + $0x110] sm:$0xff] %v53_v34  ;;  %133 = vst [vmem:[%s662_s3 + $0x250] sm:$0xff] %v53_v34 }
  0x33   :  { %94 = vst [vmem:[%s662_s3 + $0x118] sm:$0xff] %v54_v35  ;;  %134 = vst [vmem:[%s662_s3 + $0x258] sm:$0xff] %v54_v35 }
  0x34   :  { %95 = vst [vmem:[%s662_s3 + $0x120] sm:$0x1f] %v55_v36  ;;  %135 = vst [vmem:[%s662_s3 + $0x260] sm:$0x1f] %v55_v36 }
  0x35   :  { %96 = vst [vmem:[%s662_s3 + $0x128] sm:$0x1f] %v56_v37  ;;  %136 = vst [vmem:[%s662_s3 + $0x268] sm:$0x1f] %v56_v37 }
  0x36   :  { %97 = vst [vmem:[%s662_s3 + $0x130] sm:$0x1f] %v57_v38  ;;  %137 = vst [vmem:[%s662_s3 + $0x270] sm:$0x1f] %v57_v38 }
  0x37   :  { %98 = vst [vmem:[%s662_s3 + $0x138] sm:$0x1f] %v58_v39  ;;  %138 = vst [vmem:[%s662_s3 + $0x278] sm:$0x1f] %v58_v39 }
  0x38   :  { %157 = vst [vmem:[%s662_s3 + $0x20] ss:$-28 sps:$4 sm:$0xe1] %v149_v42   ;;  %159 = vst [vmem:[%s662_s3 + $0x30] ss:$-28 sps:$4 sm:$0xe1] %v151_v44  }
  0x39   :  { %206 = vst [vmem:[%s662_s3 + $0x160] ss:$-28 sps:$4 sm:$0xe1] %v176_v48   ;;  %208 = vst [vmem:[%s662_s3 + $0x170] ss:$-28 sps:$4 sm:$0xe1] %v178_v50  }
  0x3a   :  { %158 = vst [vmem:[%s662_s3 + $0x28] ss:$-28 sps:$4 sm:$0xe1] %v150_v52   ;;  %160 = vst [vmem:[%s662_s3 + $0x38] ss:$-28 sps:$4 sm:$0xe1] %v152_v53  }
  0x3b   :  { %207 = vst [vmem:[%s662_s3 + $0x168] ss:$-28 sps:$4 sm:$0xe1] %v177_v54   ;;  %209 = vst [vmem:[%s662_s3 + $0x178] ss:$-28 sps:$4 sm:$0xe1] %v179_v55  }

</bundles_post_ra>
